<compile_context>
chip_gen: v5e
topology: v5e:2x2
jax: 0.10.0
libtpu: 0.0.40
codegen_flags: <defaults>
</compile_context>

<pallas_src>
import functools

import jax
import jax.numpy as jnp
from jax import lax
from jax.experimental import pallas as pl
from jax.experimental.pallas import tpu as pltpu

GIN_EPS = 0.0        # GINConv default eps (train_eps=False); folded into adj diagonal
BN_EPS = 1e-5        # BatchNorm1d default eps


def _round_up(x, m):
    return ((x + m - 1) // m) * m


def _pick_tile(requested, total, align):
    """Largest multiple of `align` that is <= requested and divides `total`."""
    t = min(requested, total)
    t = max(align, (t // align) * align)
    while total % t:
        t -= align
    return t


# --------------------- kernel 1: K-tiled aggregation + Linear1 + ReLU ---------------------
def _agg_mlp1_kernel(adj_ref, xhi_ref, xlo_ref, w1_ref, b1_ref,
                     h1_ref, psum_ref, pssq_ref, acc_ref, *, n_real, tile_n):
    i = pl.program_id(0)          # node-row tile (parallel)
    k = pl.program_id(1)          # adjacency-column reduction tile (arbitrary)

    @pl.when(k == 0)
    def _init():
        acc_ref[...] = jnp.zeros_like(acc_ref)

    # GIN aggregation (self loop already folded into the adjacency diagonal).
    # adj is bf16 (exact integer counts); x comes as a bf16 hi/lo split so both
    # matmuls run on the native bf16 MXU path with f32 accumulation (~f32 accuracy).
    adj = adj_ref[...]
    acc_ref[...] += (
        jnp.dot(adj, xhi_ref[...], preferred_element_type=jnp.float32)
        + jnp.dot(adj, xlo_ref[...], preferred_element_type=jnp.float32))

    @pl.when(k == pl.num_programs(1) - 1)
    def _finalize():
        h = acc_ref[...]                                           # (tile_n, f_pad) f32
        h1 = jnp.dot(h, w1_ref[...], preferred_element_type=jnp.float32) + b1_ref[...]
        h1 = jnp.maximum(h1, 0.0)

        # Zero padded rows so they do not pollute the BatchNorm statistics.
        rows = i * tile_n + lax.broadcasted_iota(jnp.int32, (tile_n, 1), 0)
        h1 = jnp.where(rows < n_real, h1, 0.0)

        h1_ref[...] = h1
        # Per-row-tile partial BN statistics; reduced across tiles in plain JAX.
        # (One-pass E[x^2]-E[x]^2 variance, clamped >= 0; fine for ReLU-scale
        #  activations.  TODO(synk): switch to Welford if activations get large.)
        psum_ref[...] = jnp.sum(h1, axis=0, keepdims=True).reshape(1, 1, -1)
        pssq_ref[...] = jnp.sum(h1 * h1, axis=0, keepdims=True).reshape(1, 1, -1)


# --------------------- kernel 2: BN affine + fused (Linear2 @ fc) matmul -------------------
def _bn_fc_kernel(h1_ref, scale_ref, shift_ref, wcomb_ref, bcomb_ref, out_ref):
    # scale = gamma / sqrt(var + eps), shift = beta - mean * scale  (computed in wrapper
    # from the reduced batch statistics) -> exact BatchNorm1d with batch stats.
    hbn = h1_ref[...] * scale_ref[...] + shift_ref[...]
    out = jnp.dot(hbn, wcomb_ref[...], preferred_element_type=jnp.float32)
    out_ref[...] = (out + bcomb_ref[...]).astype(out_ref.dtype)


def gin_forward(x, edge_index, params, *, tile_n=512, tile_k=1024, interpret=False):
    """x: [N, nfeat] float32, edge_index: [2, E] int32 (row 0 = src, row 1 = dst)."""
    n, nfeat = x.shape
    nhid = params["w1"].shape[1]
    nclass = params["wfc"].shape[1]

    # Pad every dim to lane/sublane-friendly sizes (exact: zero padding + masking).
    f_pad = _round_up(nfeat, 128)
    h_pad = _round_up(nhid, 128)
    c_pad = _round_up(nclass, 128)
    n_pad = _round_up(n, 128)

    # tile_n: sublane dim of adj / h1 / out blocks  -> multiple of 8.
    # tile_k: lane dim of adj blocks, sublane dim of x blocks -> multiple of 128.
    tile_n = _pick_tile(tile_n, n_pad, 8)
    tile_k = _pick_tile(tile_k, n_pad, 128)
    n_tiles = n_pad // tile_n
    k_tiles = n_pad // tile_k

    hi = lax.Precision.HIGHEST

    # ---- features: pad, then split into bf16 hi/lo (same total HBM bytes as f32) ----
    xp = jnp.zeros((n_pad, f_pad), jnp.float32).at[:n, :nfeat].set(x.astype(jnp.float32))
    x_hi = xp.astype(jnp.bfloat16)
    x_lo = (xp - x_hi.astype(jnp.float32)).astype(jnp.bfloat16)

    # ---- dense adjacency built directly in bf16 (no f32 N^2 intermediate) ----
    # Edge multiplicities are small integers -> exact in bf16 (exact up to 256 parallel
    # edges per (dst, src) pair).  The GIN self term (1+eps)*x_i is folded onto the
    # diagonal, exact because eps == 0.
    src = edge_index[0].astype(jnp.int32)
    dst = edge_index[1].astype(jnp.int32)
    diag = jnp.arange(n, dtype=jnp.int32)
    rows_idx = jnp.concatenate([dst, diag])
    cols_idx = jnp.concatenate([src, diag])
    vals = jnp.concatenate([jnp.ones((src.shape[0],), jnp.bfloat16),
                            jnp.full((n,), 1.0 + GIN_EPS, jnp.bfloat16)])
    adj = jnp.zeros((n_pad, n_pad), jnp.bfloat16).at[rows_idx, cols_idx].add(vals)

    # ---- parameters: pad; fold Linear(nhid,nhid) and fc into one matmul ----
    w1 = jnp.zeros((f_pad, h_pad), jnp.float32).at[:nfeat, :nhid].set(params["w1"])
    b1 = jnp.zeros((1, h_pad), jnp.float32).at[:, :nhid].set(params["b1"])
    gamma = jnp.zeros((1, h_pad), jnp.float32).at[:, :nhid].set(params["gamma"])
    beta = jnp.zeros((1, h_pad), jnp.float32).at[:, :nhid].set(params["beta"])

    wcomb = jnp.dot(params["w2"], params["wfc"], precision=hi)               # (nhid, nclass)
    bcomb = jnp.dot(params["b2"], params["wfc"], precision=hi) + params["bfc"]
    wcomb = jnp.zeros((h_pad, c_pad), jnp.float32).at[:nhid, :nclass].set(wcomb)
    bcomb = jnp.zeros((1, c_pad), jnp.float32).at[:, :nclass].set(bcomb)

    # ---------------- call 1: aggregation + Linear1 + ReLU + partial BN stats ----------------
    kernel1 = functools.partial(_agg_mlp1_kernel, n_real=n, tile_n=tile_n)

    # VMEM estimate (double buffers on streamed operands) with margin, capped at 40 MiB
    # so the request also fits v7x's 64 MiB physical VMEM.
    est1 = (2 * tile_n * tile_k * 2                  # adj (bf16, 2 buffers)
            + 2 * 2 * tile_k * f_pad * 2             # x_hi + x_lo (bf16, 2 buffers each)
            + 2 * (f_pad * h_pad + h_pad) * 4        # w1, b1 (tiny; default buffering)
            + 2 * (tile_n * h_pad + 2 * h_pad) * 4   # h1 + psum + pssq outputs
            + tile_n * f_pad * 4)                    # f32 aggregation accumulator
    vmem1 = int(min(max(4 * est1, 32 * 1024 * 1024), 40 * 1024 * 1024))

    h1, psum, pssq = pl.pallas_call(
        kernel1,
        out_shape=(
            jax.ShapeDtypeStruct((n_pad, h_pad), jnp.float32),
            jax.ShapeDtypeStruct((n_tiles, 1, h_pad), jnp.float32),
            jax.ShapeDtypeStruct((n_tiles, 1, h_pad), jnp.float32),
        ),
        grid=(n_tiles, k_tiles),
        in_specs=[
            pl.BlockSpec((tile_n, tile_k), lambda i, k: (i, k)),   # adj row/col tile
            pl.BlockSpec((tile_k, f_pad), lambda i, k: (k, 0)),    # x_hi k-slab
            pl.BlockSpec((tile_k, f_pad), lambda i, k: (k, 0)),    # x_lo k-slab
            pl.BlockSpec((f_pad, h_pad), lambda i, k: (0, 0)),     # W1 (constant, tiny)
            pl.BlockSpec((1, h_pad), lambda i, k: (0, 0)),         # b1
        ],
        out_specs=(
            pl.BlockSpec((tile_n, h_pad), lambda i, k: (i, 0)),    # h1 tile
            pl.BlockSpec((1, 1, h_pad), lambda i, k: (i, 0, 0)),   # partial BN sum
            pl.BlockSpec((1, 1, h_pad), lambda i, k: (i, 0, 0)),   # partial BN sumsq
        ),
        scratch_shapes=[pltpu.VMEM((tile_n, f_pad), jnp.float32)],
        compiler_params=pltpu.CompilerParams(
            dimension_semantics=("parallel", "arbitrary"),
            vmem_limit_bytes=vmem1,
        ),
        interpret=interpret,
    )(adj, x_hi, x_lo, w1, b1)

    # ---------------- plain-JAX glue: reduce BN stats, build affine scale/shift --------------
    inv_n = 1.0 / float(n)
    bn_sum = jnp.sum(psum[:, 0, :], axis=0, keepdims=True)
    bn_ssq = jnp.sum(pssq[:, 0, :], axis=0, keepdims=True)
    mean = bn_sum * inv_n
    var = jnp.maximum(bn_ssq * inv_n - mean * mean, 0.0)      # biased variance (BN train mode)
    scale = gamma * lax.rsqrt(var + BN_EPS)
    shift = beta - mean * scale

    # ---------------- call 2: BN affine + fused (W2 @ Wfc) matmul ----------------------------
    est2 = (2 * (tile_n * h_pad + tile_n * c_pad) * 4
            + 2 * (h_pad * c_pad + 2 * h_pad + c_pad) * 4)
    vmem2 = int(min(max(4 * est2, 32 * 1024 * 1024), 40 * 1024 * 1024))

    out = pl.pallas_call(
        _bn_fc_kernel,
        out_shape=jax.ShapeDtypeStruct((n_pad, c_pad), jnp.float32),
        grid=(n_tiles,),
        in_specs=[
            pl.BlockSpec((tile_n, h_pad), lambda i: (i, 0)),       # h1 tile (from HBM)
            pl.BlockSpec((1, h_pad), lambda i: (0, 0)),            # BN scale
            pl.BlockSpec((1, h_pad), lambda i: (0, 0)),            # BN shift
            pl.BlockSpec((h_pad, c_pad), lambda i: (0, 0)),        # Wcomb = W2 @ Wfc
            pl.BlockSpec((1, c_pad), lambda i: (0, 0)),            # bcomb = b2 @ Wfc + bfc
        ],
        out_specs=pl.BlockSpec((tile_n, c_pad), lambda i: (i, 0)),
        compiler_params=pltpu.CompilerParams(
            dimension_semantics=("parallel",),
            vmem_limit_bytes=vmem2,
        ),
        interpret=interpret,
    )(h1, scale, shift, wcomb, bcomb)

    return out[:n, :nclass]


def xavier_uniform(key, fan_in, fan_out):
    # Matches torch.nn.init.xavier_uniform_ on a (out, in) weight; stored transposed
    # (in, out) so the kernel right-multiplies.
    a = jnp.sqrt(6.0 / (fan_in + fan_out))
    return jax.random.uniform(key, (fan_in, fan_out), jnp.float32, -a, a)


def init_params(key, nfeat, nhid, nclass):
    k1, k2, k3 = jax.random.split(key, 3)
    return {
        "w1": xavier_uniform(k1, nfeat, nhid),
        "b1": jnp.zeros((1, nhid), jnp.float32),
        "gamma": jnp.ones((1, nhid), jnp.float32),
        "beta": jnp.zeros((1, nhid), jnp.float32),
        "w2": xavier_uniform(k2, nhid, nhid),
        "b2": jnp.zeros((1, nhid), jnp.float32),
        "wfc": xavier_uniform(k3, nhid, nclass),
        "bfc": jnp.zeros((1, nclass), jnp.float32),
    }


def gin_reference(x, edge_index, params):
    """Pure-JAX reference (unfused, unpadded, f32) for correctness checking."""
    n = x.shape[0]
    hi = lax.Precision.HIGHEST
    adj = jnp.zeros((n, n), jnp.float32).at[edge_index[1], edge_index[0]].add(1.0)
    h = jnp.dot(adj, x, precision=hi) + (1.0 + GIN_EPS) * x
    h1 = jnp.maximum(jnp.dot(h, params["w1"], precision=hi) + params["b1"], 0.0)
    mean = jnp.mean(h1, axis=0, keepdims=True)
    var = jnp.mean((h1 - mean) ** 2, axis=0, keepdims=True)
    hbn = (h1 - mean) / jnp.sqrt(var + BN_EPS) * params["gamma"] + params["beta"]
    h2 = jnp.dot(hbn, params["w2"], precision=hi) + params["b2"]
    return jnp.dot(h2, params["wfc"], precision=hi) + params["bfc"]


if __name__ == "__main__":
    N, NFEAT, NHID, NCLASS = 200, 16, 32, 4

    key = jax.random.PRNGKey(0)
    kx, ke, kp = jax.random.split(key, 3)

    x = jax.random.normal(kx, (N, NFEAT), jnp.float32)

    # Small deterministic graph: a ring plus a few random extra edges.
    ring_src = jnp.arange(N, dtype=jnp.int32)
    ring_dst = (ring_src + 1) % N
    extra_src = jax.random.randint(ke, (48,), 0, N, dtype=jnp.int32)
    extra_dst = (extra_src + 7) % N
    edge_index = jnp.stack([jnp.concatenate([ring_src, extra_src]),
                            jnp.concatenate([ring_dst, extra_dst])], axis=0)

    params = init_params(kp, NFEAT, NHID, NCLASS)

    # Small tiles so the K-tiled aggregation (k_tiles = 2), multi-row-tile stats
    # reduction (n_tiles = 4) and padded-row masking (200 real / 256 padded) are
    # all exercised at this toy size.
    out = gin_forward(x, edge_index, params, tile_n=64, tile_k=128)
    out = jax.block_until_ready(out)

    ref = gin_reference(x, edge_index, params)
    assert out.shape == (N, NCLASS)
    max_err = float(jnp.max(jnp.abs(out - ref)))
    assert jnp.allclose(out, ref, atol=2e-4, rtol=2e-4), (
        f"mismatch vs reference: max abs err = {max_err}")

    print("KERNEL_OK")
</pallas_src>

<mosaic_0001>
module attributes {stable_mosaic.version = 11 : i64} {
  func.func @_agg_mlp1_kernel(%arg0: i32, %arg1: i32, %arg2: memref<64x128xbf16, #tpu.memory_space<vmem>>, %arg3: memref<128x128xbf16, #tpu.memory_space<vmem>>, %arg4: memref<128x128xbf16, #tpu.memory_space<vmem>>, %arg5: memref<128x128xf32, #tpu.memory_space<vmem>>, %arg6: memref<1x128xf32, #tpu.memory_space<vmem>>, %arg7: memref<64x128xf32, #tpu.memory_space<vmem>>, %arg8: memref<1x1x128xf32, #tpu.memory_space<vmem>>, %arg9: memref<1x1x128xf32, #tpu.memory_space<vmem>>, %arg10: memref<64x128xf32, #tpu.memory_space<vmem>>) attributes {dimension_semantics = [#tpu.dimension_semantics<parallel>, #tpu.dimension_semantics<arbitrary>], iteration_bounds = array<i64: 4, 2>, scalar_prefetch = 0 : i64, scratch_operands = 1 : i64, tpu.core_type = #tpu.core_type<tc>, window_params = [{transform_indices = @transform_0, window_bounds = array<i64: 64, 128>}, {transform_indices = @transform_1, window_bounds = array<i64: 128, 128>}, {transform_indices = @transform_2, window_bounds = array<i64: 128, 128>}, {pipeline_mode = #tpu.pipeline_mode<synchronous>, transform_indices = @transform_3, window_bounds = array<i64: 128, 128>}, {pipeline_mode = #tpu.pipeline_mode<synchronous>, transform_indices = @transform_4, window_bounds = array<i64: 1, 128>}, {transform_indices = @transform_5, window_bounds = array<i64: 64, 128>}, {transform_indices = @transform_6, window_bounds = array<i64: 1, 1, 128>}, {transform_indices = @transform_7, window_bounds = array<i64: 1, 1, 128>}]} {
    %c0_i32 = arith.constant 0 : i32
    %0 = arith.cmpi eq, %arg1, %c0_i32 : i32
    %1 = arith.extui %0 : i1 to i32
    %c0_i32_0 = arith.constant 0 : i32
    %2 = arith.cmpi ne, %1, %c0_i32_0 : i32
    scf.if %2 {
      %cst_12 = arith.constant 0.000000e+00 : f32
      %15 = vector.broadcast %cst_12 : f32 to vector<64x128xf32>
      %c0_13 = arith.constant 0 : index
      %c0_14 = arith.constant 0 : index
      %16 = vector.load %arg10[%c0_13, %c0_14] : memref<64x128xf32, #tpu.memory_space<vmem>>, vector<64x128xf32>
      tpu.vector_store %arg10[%c0_13, %c0_14], %15 {strides = array<i32>} : memref<64x128xf32, #tpu.memory_space<vmem>>, vector<64x128xf32>,
    } else {
    }
    %c0 = arith.constant 0 : index
    %c0_1 = arith.constant 0 : index
    %3 = vector.load %arg2[%c0, %c0_1] : memref<64x128xbf16, #tpu.memory_space<vmem>>, vector<64x128xbf16>
    %c0_2 = arith.constant 0 : index
    %c0_3 = arith.constant 0 : index
    %4 = vector.load %arg10[%c0_2, %c0_3] : memref<64x128xf32, #tpu.memory_space<vmem>>, vector<64x128xf32>
    %c0_4 = arith.constant 0 : index
    %c0_5 = arith.constant 0 : index
    %5 = vector.load %arg3[%c0_4, %c0_5] : memref<128x128xbf16, #tpu.memory_space<vmem>>, vector<128x128xbf16>
    %cst = arith.constant dense<0.000000e+00> : vector<64x128xf32>
    %6 = tpu.matmul %3, %5, %cst {dimension_numbers = #tpu.dot_dimension_numbers<[1], [0], [0], [1], [0, 0, 1, 1], [], []>} : vector<64x128xbf16>, vector<128x128xbf16>, vector<64x128xf32> -> vector<64x128xf32>
    %c0_6 = arith.constant 0 : index
    %c0_7 = arith.constant 0 : index
    %7 = vector.load %arg4[%c0_6, %c0_7] : memref<128x128xbf16, #tpu.memory_space<vmem>>, vector<128x128xbf16>
    %cst_8 = arith.constant dense<0.000000e+00> : vector<64x128xf32>
    %8 = tpu.matmul %3, %7, %cst_8 {dimension_numbers = #tpu.dot_dimension_numbers<[1], [0], [0], [1], [0, 0, 1, 1], [], []>} : vector<64x128xbf16>, vector<128x128xbf16>, vector<64x128xf32> -> vector<64x128xf32>
    %9 = arith.addf %6, %8 : vector<64x128xf32>
    %10 = arith.addf %4, %9 : vector<64x128xf32>
    %c0_9 = arith.constant 0 : index
    %c0_10 = arith.constant 0 : index
    %11 = vector.load %arg10[%c0_9, %c0_10] : memref<64x128xf32, #tpu.memory_space<vmem>>, vector<64x128xf32>
    tpu.vector_store %arg10[%c0_9, %c0_10], %10 {strides = array<i32>} : memref<64x128xf32, #tpu.memory_space<vmem>>, vector<64x128xf32>,
    %c1_i32 = arith.constant 1 : i32
    %12 = arith.cmpi eq, %arg1, %c1_i32 : i32
    %13 = arith.extui %12 : i1 to i32
    %c0_i32_11 = arith.constant 0 : i32
    %14 = arith.cmpi ne, %13, %c0_i32_11 : i32
    scf.if %14 {
      %c0_12 = arith.constant 0 : index
      %c0_13 = arith.constant 0 : index
      %15 = vector.load %arg10[%c0_12, %c0_13] : memref<64x128xf32, #tpu.memory_space<vmem>>, vector<64x128xf32>
      %c0_14 = arith.constant 0 : index
      %c0_15 = arith.constant 0 : index
      %16 = vector.load %arg5[%c0_14, %c0_15] : memref<128x128xf32, #tpu.memory_space<vmem>>, vector<128x128xf32>
      %cst_16 = arith.constant dense<0.000000e+00> : vector<64x128xf32>
      %17 = tpu.matmul %15, %16, %cst_16 {dimension_numbers = #tpu.dot_dimension_numbers<[1], [0], [0], [1], [0, 0, 1, 1], [], []>} : vector<64x128xf32>, vector<128x128xf32>, vector<64x128xf32> -> vector<64x128xf32>
      %c0_17 = arith.constant 0 : index
      %c0_18 = arith.constant 0 : index
      %18 = vector.load %arg6[%c0_17, %c0_18] : memref<1x128xf32, #tpu.memory_space<vmem>>, vector<1x128xf32>
      %19 = vector.broadcast %18 : vector<1x128xf32> to vector<64x128xf32>
      %20 = arith.addf %17, %19 : vector<64x128xf32>
      %cst_19 = arith.constant 0.000000e+00 : f32
      %21 = vector.broadcast %cst_19 : f32 to vector<64x128xf32>
      %22 = arith.maximumf %20, %21 : vector<64x128xf32>
      %c64_i32 = arith.constant 64 : i32
      %23 = arith.muli %arg0, %c64_i32 : i32
      %24 = tpu.iota {dimensions = array<i32: 0>} : vector<64x1xi32>
      %25 = vector.broadcast %23 : i32 to vector<64x1xi32>
      %26 = arith.addi %25, %24 : vector<64x1xi32>
      %c200_i32 = arith.constant 200 : i32
      %27 = vector.broadcast %c200_i32 : i32 to vector<64x1xi32>
      %28 = arith.cmpi slt, %26, %27 : vector<64x1xi32>
      %cst_20 = arith.constant 0.000000e+00 : f32
      %29 = vector.shape_cast %28 : vector<64x1xi1> to vector<64x1xi1>
      %30 = vector.broadcast %29 : vector<64x1xi1> to vector<64x128xi1>
      %31 = vector.broadcast %cst_20 : f32 to vector<64x128xf32>
      %32 = arith.select %30, %22, %31 : vector<64x128xi1>, vector<64x128xf32>
      %c0_21 = arith.constant 0 : index
      %c0_22 = arith.constant 0 : index
      %33 = vector.load %arg7[%c0_21, %c0_22] : memref<64x128xf32, #tpu.memory_space<vmem>>, vector<64x128xf32>
      tpu.vector_store %arg7[%c0_21, %c0_22], %32 {strides = array<i32>} : memref<64x128xf32, #tpu.memory_space<vmem>>, vector<64x128xf32>,
      %cst_23 = arith.constant dense<0.000000e+00> : vector<128xf32>
      %34 = vector.multi_reduction <add>, %32, %cst_23 [0] : vector<64x128xf32> to vector<128xf32>
      %35 = vector.shape_cast %34 : vector<128xf32> to vector<1x128xf32>
      %36 = vector.shape_cast %35 : vector<1x128xf32> to vector<1x1x128xf32>
      %c0_24 = arith.constant 0 : index
      %c0_25 = arith.constant 0 : index
      %c0_26 = arith.constant 0 : index
      %37 = vector.load %arg8[%c0_24, %c0_25, %c0_26] : memref<1x1x128xf32, #tpu.memory_space<vmem>>, vector<1x1x128xf32>
      tpu.vector_store %arg8[%c0_24, %c0_25, %c0_26], %36 {strides = array<i32>} : memref<1x1x128xf32, #tpu.memory_space<vmem>>, vector<1x1x128xf32>,
      %38 = arith.mulf %32, %32 : vector<64x128xf32>
      %cst_27 = arith.constant dense<0.000000e+00> : vector<128xf32>
      %39 = vector.multi_reduction <add>, %38, %cst_27 [0] : vector<64x128xf32> to vector<128xf32>
      %40 = vector.shape_cast %39 : vector<128xf32> to vector<1x128xf32>
      %41 = vector.shape_cast %40 : vector<1x128xf32> to vector<1x1x128xf32>
      %c0_28 = arith.constant 0 : index
      %c0_29 = arith.constant 0 : index
      %c0_30 = arith.constant 0 : index
      %42 = vector.load %arg9[%c0_28, %c0_29, %c0_30] : memref<1x1x128xf32, #tpu.memory_space<vmem>>, vector<1x1x128xf32>
      tpu.vector_store %arg9[%c0_28, %c0_29, %c0_30], %41 {strides = array<i32>} : memref<1x1x128xf32, #tpu.memory_space<vmem>>, vector<1x1x128xf32>,
    } else {
    }
    return
  }
  func.func @transform_0(%arg0: i32, %arg1: i32) -> (i32, i32) {
    %c0_i32 = arith.constant 0 : i32
    return %arg0, %arg1 : i32, i32
  }
  func.func @transform_1(%arg0: i32, %arg1: i32) -> (i32, i32) {
    %c0_i32 = arith.constant 0 : i32
    %c0_i32_0 = arith.constant 0 : i32
    return %arg1, %c0_i32 : i32, i32
  }
  func.func @transform_2(%arg0: i32, %arg1: i32) -> (i32, i32) {
    %c0_i32 = arith.constant 0 : i32
    %c0_i32_0 = arith.constant 0 : i32
    return %arg1, %c0_i32 : i32, i32
  }
  func.func @transform_3(%arg0: i32, %arg1: i32) -> (i32, i32) {
    %c0_i32 = arith.constant 0 : i32
    %c0_i32_0 = arith.constant 0 : i32
    %c0_i32_1 = arith.constant 0 : i32
    return %c0_i32, %c0_i32_0 : i32, i32
  }
  func.func @transform_4(%arg0: i32, %arg1: i32) -> (i32, i32) {
    %c0_i32 = arith.constant 0 : i32
    %c0_i32_0 = arith.constant 0 : i32
    %c0_i32_1 = arith.constant 0 : i32
    return %c0_i32, %c0_i32_0 : i32, i32
  }
  func.func @transform_5(%arg0: i32, %arg1: i32) -> (i32, i32) {
    %c0_i32 = arith.constant 0 : i32
    %c0_i32_0 = arith.constant 0 : i32
    return %arg0, %c0_i32 : i32, i32
  }
  func.func @transform_6(%arg0: i32, %arg1: i32) -> (i32, i32, i32) {
    %c0_i32 = arith.constant 0 : i32
    %c0_i32_0 = arith.constant 0 : i32
    %c0_i32_1 = arith.constant 0 : i32
    return %arg0, %c0_i32, %c0_i32_0 : i32, i32, i32
  }
  func.func @transform_7(%arg0: i32, %arg1: i32) -> (i32, i32, i32) {
    %c0_i32 = arith.constant 0 : i32
    %c0_i32_0 = arith.constant 0 : i32
    %c0_i32_1 = arith.constant 0 : i32
    return %arg0, %c0_i32, %c0_i32_0 : i32, i32, i32
  }
}

</mosaic_0001>

<bundles_post_ra>
// kernel: tpu_custom_call.1
= control target key start
LH: loop header
LB: loop body
LE: loop exit
PB: predicated region body
PF: predicated region fallthrough
CT: control target
= control target key end

     0   :  { %s2267_s0 = inlined_call_operand.hbm [shape: bf16[256,256], index: 0, kind: input, shape index: {}]   ;;  %s2268_s1 = inlined_call_operand.hbm [shape: bf16[256,128], index: 1, kind: input, shape index: {}]   ;;  %s2269_s2 = inlined_call_operand.hbm [shape: bf16[256,128], index: 2, kind: input, shape index: {}]   ;;  %s2270_s3 = inlined_call_operand.hbm [shape: f32[128,128], index: 3, kind: input, shape index: {}]   ;;  %s2271_s4 = inlined_call_operand.vmem [shape: f32[1,128], index: 4, kind: input, shape index: {}]   ;;  %s2272_s5 = inlined_call_operand.hbm [shape: f32[256,128], index: 5, kind: output, shape index: {0}]   ;;  %s2273_s6 = inlined_call_operand.hbm [shape: f32[4,1,128], index: 6, kind: output, shape index: {1}]   ;;  %s2274_s7 = inlined_call_operand.hbm [shape: f32[4,1,128], index: 7, kind: output, shape index: {2}]  }
   0x1   :  { %2303 = sst [smem:[#allocation34_spill]] %s2267_s0 }
   0x2   :  { %2304 = sst [smem:[#allocation35_spill]] %s2268_s1 }
   0x3   :  { %2305 = sst [smem:[#allocation36_spill]] %s2269_s2 }
   0x4   :  { %2306 = sst [smem:[#allocation37_spill]] %s2270_s3 }
   0x5   :  { %2307 = sst [smem:[#allocation38_spill]] %s2271_s4 }
   0x6   :  { %2308 = sst [smem:[#allocation39_spill]] %s2272_s5 }
   0x7   :  { %2309 = sst [smem:[#allocation40_spill]] %s2273_s6 }
   0x8   :  { %2310 = sst [smem:[#allocation41_spill]] %s2274_s7 }
   0x9   :  { %13 = vsyncpa [#allocation4], 0 }
   0xa   :  { %15 = vsyncpa [#allocation4 + $0x1], 0 }
   0xb   :  { %16 = vsyncpa [#allocation7], 0 }
   0xc   :  { %18 = vsyncpa [#allocation7 + $0x1], 0 }
   0xd   :  { %19 = vsyncpa [#allocation10], 0 }
   0xe   :  { %20 = vsyncpa [#allocation5], 0 }
   0xf   :  { %22 = vsyncpa [#allocation5 + $0x1], 0 }
  0x10   :  { %23 = vsyncpa [#allocation13], 0 }
  0x11   :  { %25 = vsyncpa [#allocation13 + $0x1], 0  ;;  %s1851_s24 = smov 0   ;;  %s1853_s25 = smov 0  }
  0x12   :  { %s1855_s26 = smov 0   ;;  %s1857_s27 = smov 0  }
  0x13   :  { %s1859_s28 = smov 0   ;;  %s1861_s29 = smov 0  }
  0x14   :  { %s1863_s30 = smov 0   ;;  %s1865_s8 = smov 0  }
  0x15   :  { %s1867_s9 = smov 0   ;;  %s1869_s10 = smov 0  }
  0x16   :  { %s1871_s11 = smov 0   ;;  %s1873_s12 = smov 0  }
  0x17   :  { %s1875_s13 = smov 0   ;;  %s1877_s14 = smov 0  }
  0x18 LB: > { %2311 = sst [smem:[#allocation20_spill]] %s1749_s24  ;;  %s40_s15 = sadd.s32 1, %s1793_s12  ;;  %s1801_s14 = sphi %s1877_s14, %s31_s14   ;;  %s1797_s13 = sphi %s1875_s13, %s2381_s13   ;;  %s1793_s12 = sphi %s1873_s12, %s2380_s12   ;;  %s1789_s11 = sphi %s1871_s11, %s2379_s11   ;;  %s1785_s10 = sphi %s1869_s10, %s2378_s10   ;;  %s1781_s9 = sphi %s1867_s9, %s2377_s9   ;;  %s1777_s8 = sphi %s1865_s8, %s2376_s8   ;;  %s1773_s30 = sphi %s1863_s30, %s2375_s30   ;;  %s1769_s29 = sphi %s1861_s29, %s2367_s29   ;;  %s1765_s28 = sphi %s1859_s28, %s2366_s28   ;;  %s1761_s27 = sphi %s1857_s27, %s2374_s27   ;;  %s1757_s26 = sphi %s1855_s26, %s2373_s26   ;;  %s1753_s25 = sphi %s1853_s25, %s2372_s25   ;;  %s1749_s24 = sphi %s1851_s24, %s2371_s24  }
  0x19   : > { %2312 = sst [smem:[#allocation21_spill]] %s1753_s25  ;;  %p1922_p0 = scmp.ge.s32.totalorder %s40_s15, 2 }
  0x1a   : > { %2313 = sst [smem:[#allocation22_spill]] %s1765_s28  ;;  %p2281_p1 = scmp.eq.s32.totalorder %s1801_s14, 0 }
  0x1b   : > { %2314 = sst [smem:[#allocation23_spill]] %s1769_s29  ;;  %s78_s17 = sadd.s32 1, %s1769_s29 }
  0x1c   : > { %2315 = sst [smem:[#allocation24_spill]] %s1785_s10  ;;  %p85_p2 = scmp.ne.s32.totalorder %s1769_s29, %s1765_s28 }
  0x1d   : > { %2316 = sst [smem:[#allocation25_spill]] %s1789_s11  ;;  %s2383_s15 = smov (%p1922_p0, %s40_s15), 0 }
  0x1e   : > { %2318 = sst [smem:[#allocation26_spill]] %s2383_s15  ;;  %p91_p3 = scmp.ne.s32.totalorder %s1765_s28, %s1761_s27 }
  0x1f   : > { %s1938_s18 = ssub.s32 %s1793_s12, %s2383_s15  ;;  %p1942_p4 = por %p85_p2, %p2281_p1 }
  0x20   : > { %p76_p5 = scmp.eq.s32.totalorder %s1938_s18, 0  ;;  %p2280_p6 = scmp.lt.s32.totalorder %s1801_s14, 8 }
  0x21   : > { %s302_s21 = sand.u32 1, %s1801_s14   ;;  %s304_s22 = sand.u32 1, %s1769_s29  }
  0x22   : > { %s1949_s20 = scalar_select %p76_p5, %s1769_s29, %s78_s17  }
  0x23   : > { %s1114_s23 = sshll.u32 %s304_s22, 6  ;;  %s1215_s7 = sshll.u32 %s1793_s12, 6 }
  0x24   : > { %2320 = sst [smem:[#allocation27_spill]] %s1949_s20  ;;  %s306_s11 = scalar_lea.vmem [#allocation6], %s1114_s23 }
  0x25   : > { %s2321_s1 = sld [smem:[#allocation35_spill]]  ;;  %s314_s10 = sshll.u32 %s306_s11, 4  ;;  %s315_s10 = int_to_ptr.vmem [resolvable:$true] %s314_s10 }
  0x26   : > { %p1961_p7 = pnand %p2280_p6, %p1942_p4  ;;  %s2323_s2 = sld [smem:[#allocation36_spill]] }
  0x27   : > { %s2282_s11 = smov 64   ;;  %s2285_s19 = smov 4  }
  0x28   : > { %s2284_s5 = sadd.s32 4294967294, %s1801_s14   ;;  %p65_p8 = scmp.ne.s32.totalorder %s1777_s8, %s1773_s30 }
  0x29   : > { %p182_p10 = scmp.ne.s32.totalorder %s1757_s26, %s1753_s25  ;;  %p188_p4 = scmp.ne.s32.totalorder %s1753_s25, %s1749_s24 }
  0x2a   : > { %p189_p5 = scmp.eq.s32.totalorder %s2284_s5, 7  ;;  %p1107_p6 = scmp.ge.s32.totalorder %s1801_s14, 1 }
  0x2b   : > { %s311_s15 = scalar_lea.hbm %s2321_s1, %s1215_s7  ;;  %s1968_s1 = scalar_lea.sflag [#allocation7], %s302_s21 }
  0x2c   : > { %s312_s4 = sshll.u32 %s311_s15, 4  ;;  %s333_s6 = scalar_lea.hbm %s2323_s2, %s1215_s7  ;;  %s313_s4 = int_to_ptr.hbm [resolvable:$true] %s312_s4 }
  0x2d   : > { %s334_s15 = sshll.u32 %s333_s6, 4  ;;  %s328_s7 = scalar_lea.vmem [#allocation8], %s1114_s23  ;;  %s1976_s15 = int_to_ptr.hbm [resolvable:$true] %s334_s15 }
  0x2e   : > { %1328 = dma.hbm_to_vmem [thread:$0]  (!%p1961_p7), %s313_s4, 1024, %s315_s10, %s1968_s1, %s2282_s11, %s2282_s11, %s2285_s19  }
  0x2f   : > { %s1978_s22 = sshll.u32 %s328_s7, 4  ;;  %s1981_s21 = sadd.s32 4294967295, %s1801_s14   ;;  %s337_s22 = int_to_ptr.vmem [resolvable:$true] %s1978_s22 }
  0x30   : > { %2324 = sst [smem:[#allocation28_spill]] %s1981_s21  ;;  %p66_p9 = scmp.eq.s32.totalorder %s1981_s21, 0 }
  0x31   : > { %p183_p11 = scmp.eq.s32.totalorder %s1981_s21, 7  ;;  %p2015_p1 = por %p189_p5, %p188_p4 }
  0x32   : > { %p1992_p12 = por %p66_p9, %p65_p8  ;;  %p2001_p13 = por %p91_p3, %p66_p9 }
  0x33   : > { %p2005_p2 = por %p183_p11, %p182_p10  ;;  %p248_p8 = scmp.lt.s32.totalorder %s1801_s14, 9 }
  0x34   : > { %s2325_s4 = scalar_select %p1992_p12, 1, 0 }
  0x35   : > { %s2327_s10 = scalar_select %p2001_p13, 1, 0 }
  0x36   : > { %2326 = sst [smem:[#allocation29_spill]] %s2325_s4  ;;  %p2022_p3 = pnand %p1107_p6, %p248_p8 }
  0x37   : > { %2328 = sst [smem:[#allocation30_spill]] %s2327_s10  ;;  %s1805_s5 = smov [#allocation9]  }
  0x38   : > { %s2329_s23 = scalar_select %p2005_p2, 1, 0 }
  0x39   : > { %s2331_s27 = scalar_select %p2015_p1, 1, 0 }
  0x3a   : > { %2330 = sst [smem:[#allocation31_spill]] %s2329_s23  ;;  %p1318_p10 = pneg %p2022_p3 }
  0x3b   : > { %2332 = sst [smem:[#allocation32_spill]] %s2331_s27  ;;  %s261_s19 = sshll.u32 %s1805_s5, 4  ;;  %s262_s19 = int_to_ptr.vmem [resolvable:$true] %s261_s19 }
  0x3c   : > { %s2333_s3 = sld [smem:[#allocation37_spill]]  ;;  %p1319_p11 = pnand %p1318_p10, %p66_p9 }
  0x3d   : > { %s2288_s30 = smov 128   ;;  %s1807_s6 = smov 8  }
  0x3e   : > { %s43_s2 = sadd.s32 1, %s1797_s13  ;;  %p59_p6 = scmp.ne.s32.totalorder %s1781_s9, %s1777_s8 }
  0x3f   : > { %s2385_s2 = smov (!%p1922_p0, %s43_s2), %s1797_s13  ;;  %s172_s5 = sadd.s32 1, %s1757_s26 }
  0x40   : > { %p45_p4 = scmp.ge.s32.totalorder %s2385_s2, 4  ;;  %s278_s20 = sand.u32 1, %s1781_s9  }
  0x41   : > { %p2335_p5 = scmp.eq.s32.totalorder %s1801_s14, 0  ;;  %s2338_s0 = sld [smem:[#allocation34_spill]] }
  0x42   : > { %s259_s7 = sshll.u32 %s2333_s3, 4  ;;  %s52_s3 = sadd.s32 1, %s1781_s9  ;;  %s260_s7 = int_to_ptr.hbm [resolvable:$true] %s259_s7 }
  0x43   : > { %1321 = dma.hbm_to_vmem [thread:$0]  (!%p1319_p11), %s260_s7, 2048, %s262_s19, [#allocation10], %s2288_s30, %s2288_s30, %s1807_s6  }
  0x44   : > { %p2043_p8 = por %p2335_p5, %p59_p6  ;;  %s2387_s2 = smov (%p45_p4, %s2385_s2), 0 }
  0x45   : > { %2337 = sst [smem:[#allocation33_spill]] %s2387_s2  ;;  %s1110_s19 = sshll.u32 %s278_s20, 5 }
  0x46   : > { %s1214_s7 = sshll.u32 %s1797_s13, 4  ;;  %s47_s16 = ssub.s32 %s1797_s13, %s2387_s2 }
  0x47   : > { %s49_s6 = sor.u32 %s1938_s18, %s47_s16  ;;  %p170_p0 = scmp.eq.s32.totalorder %s47_s16, 0 }
  0x48   : > { %p50_p10 = scmp.eq.s32.totalorder %s49_s6, 0  ;;  %s287_s30 = sadd.s32 %s1793_s12, %s1214_s7 }
  0x49   : > { %s2055_s27 = scalar_select %p170_p0, %s1757_s26, %s172_s5  }
  0x4a   : > { %s2058_s24 = scalar_select %p50_p10, %s1781_s9, %s52_s3  }
  0x4b   : > { %s1113_s23 = sshll.u32 %s287_s30, 2  ;;  %s282_s25 = scalar_lea.vmem [#allocation3], %s1110_s19 }
  0x4c   : > { %s292_s10 = sshll.u32 %s282_s25, 4  ;;  %s289_s4 = scalar_lea.hbm %s2338_s0, %s1113_s23  ;;  %s293_s10 = int_to_ptr.vmem [resolvable:$true] %s292_s10 }
  0x4d   : > { %s290_s2 = sshll.u32 %s289_s4, 4  ;;  %p2339_p11 = scmp.lt.s32.totalorder %s1801_s14, 8  ;;  %s291_s2 = int_to_ptr.hbm [resolvable:$true] %s290_s2 }
  0x4e   : > { %s279_s18 = scalar_lea.sflag [#allocation4], %s278_s20  ;;  %s2340_s7 = smov 4  }
  0x4f   : > { %p1323_p6 = pnand %p2339_p11, %p2043_p8  ;;  %s2341_s5 = smov 64  }
  0x50   : > { %s2342_s16 = smov 128   ;;  %348 = sbr.rel (%p2022_p3) target bundleno = 574 (0x23e), region = 40 }
  0x51   : > { %1325 = dma.hbm_to_vmem [thread:$0]  (!%p1323_p6), %s291_s2, 512, %s293_s10, %s279_s18, %s2342_s16, %s2341_s5, %s2340_s7  }
  0x52   : > { %1331 = dma.hbm_to_vmem [thread:$0]  (!%p1961_p7), %s1976_s15, 1024, %s337_s22, %s1968_s1, %s2341_s5, %s2341_s5, %s2340_s7  }
  0x53   : > { %s350_s25 = sand.u32 (!%p2022_p3), 1, %s1777_s8  }
  0x54   : > { %s1121_s28 = sshll.u32 (!%p2022_p3), %s350_s25, 5  ;;  %s351_s29 = scalar_lea.sflag (!%p2022_p3), [#allocation4], %s350_s25 }
  0x55   : > { %s2081_s21 = scalar_lea.vmem [#allocation3], %s1121_s28 }
  0x56   : > { %1728 = dma.done.wait (%p1992_p12), %s351_s29, 512  }
  0x57   : > { %1730 = vsyncadd (%p1992_p12), %s351_s29, 4294966784  ;;  %s2344_s2 = sld [smem:[#allocation28_spill]] }
  0x58   : > { %s2345_s20 = sld [smem:[#allocation22_spill]] }
  0x5d   : > { %s360_s1 = sand.u32 1, %s2344_s2  }
  0x5e   : > { %s362_s15 = sand.u32 1, %s2345_s20   ;;  %s361_s22 = scalar_lea.sflag [#allocation7], %s360_s1 }
  0x5f   : > { %s1122_s11 = sshll.u32 %s362_s15, 6 }
  0x60   : > { %s2091_s4 = scalar_lea.vmem [#allocation6], %s1122_s11 }
  0x61   : > { %1732 = dma.done.wait (%p2001_p13), %s361_s22, 2048  }
  0x62   : > { %1734 = vsyncadd (%p2001_p13), %s361_s22, 4294965248  ;;  %s2097_s10 = scalar_lea.vmem [#allocation8], %s1122_s11 }
  0x63   : > { %1736 = dma.done.wait (%p66_p9), [#allocation10], 2048  }
  0x64   : > { %1738 = vsyncadd (%p66_p9), [#allocation10], 4294965248  ;;  %s2347_s23 = sld [smem:[#allocation21_spill]] }
  0x65   : > { %s2348_s5 = sld [smem:[#allocation24_spill]] }
  0x6a   : > { %s2104_s30 = sand.u32 1, %s2347_s23  }
  0x6b   : > { %s1125_s19 = sshll.u32 %s2104_s30, 6  ;;  %s422_s18 = scalar_lea.vmem [#allocation12], %s2104_s30 }
  0x6c   : > { %s2107_s6 = scalar_lea.vmem [#allocation11], %s1125_s19  ;;  %s2302_s7 = scalar_lea.vmem [#allocation14], %s2104_s30 }
  0x6d   : > { %p1126_p7 = scmp.ne.s32.totalorder %s2348_s5, 0 }
  0x6f   : > { %436 = sbr.rel (%p1126_p7) target bundleno = 125 (0x7d), region = 60 }
  0x74   : > { %v1808_v0 = vmov 0.0  }
  0x75   : > { %437 = vst [vmem:[#allocation2 + $0x30] sm:$0xff] %v1808_v0 }
  0x76   : > { %438 = vst [vmem:[#allocation2] sm:$0xff] %v1808_v0 }
  0x77   : > { %439 = vst [vmem:[#allocation2 + $0x18] sm:$0xff] %v1808_v0 }
  0x78   : > { %440 = vst [vmem:[#allocation2 + $0x10] sm:$0xff] %v1808_v0 }
  0x79   : > { %441 = vst [vmem:[#allocation2 + $0x8] sm:$0xff] %v1808_v0 }
  0x7a   : > { %442 = vst [vmem:[#allocation2 + $0x20] sm:$0xff] %v1808_v0 }
  0x7b   : > { %443 = vst [vmem:[#allocation2 + $0x28] sm:$0xff] %v1808_v0 }
  0x7c   : > { %444 = vst [vmem:[#allocation2 + $0x38] sm:$0xff] %v1808_v0 }
  0x7d PF: > { %v1236_v1 = vld [vmem:[%s2097_s10 + $0x38] sm:$0xff]  ;;  %v1235_v3 = vld [vmem:[%s2097_s10 + $0x30] sm:$0xff]  ;;  %v1234_v5 = vld [vmem:[%s2097_s10 + $0x28] sm:$0xff]  ;;  %s2349_s16 = sld [smem:[#allocation24_spill]] }
  0x7e   : > { %v1228_v2 = vld [vmem:[%s2091_s4 + $0x38] sm:$0xff]  ;;  %565 = vmatpush.bf16.msra.mxu0 %v1236_v1  ;;  %1238 = vmatpush.bf16.msra.mxu2 %v1236_v1  ;;  %v1227_v4 = vld [vmem:[%s2091_s4 + $0x30] sm:$0xff]  ;;  %v1226_v6 = vld [vmem:[%s2091_s4 + $0x28] sm:$0xff] }
  0x7f   : > { %642 = vmatpush.bf16.msra.mxu1 %v1228_v2  ;;  %1246 = vmatpush.bf16.msra.mxu3 %v1228_v2  ;;  %v1233_v7 = vld [vmem:[%s2097_s10 + $0x20] sm:$0xff]  ;;  %v1232_v9 = vld [vmem:[%s2097_s10 + $0x18] sm:$0xff]  ;;  %v1231_v11 = vld [vmem:[%s2097_s10 + $0x10] sm:$0xff] }
  0x80   : > { %v1225_v8 = vld [vmem:[%s2091_s4 + $0x20] sm:$0xff]  ;;  %v1224_v10 = vld [vmem:[%s2091_s4 + $0x18] sm:$0xff]  ;;  %v1223_v12 = vld [vmem:[%s2091_s4 + $0x10] sm:$0xff] }
  0x81   : > { %v1230_v13 = vld [vmem:[%s2097_s10 + $0x8] sm:$0xff]  ;;  %v1229_v15 = vld [vmem:[%s2097_s10] sm:$0xff]  ;;  %v1219_v18 = vld [vmem:[%s2081_s21 + $0x10] sm:$0xff] }
  0x82   : > { %566 = vmatpush.bf16.msra.mxu0 %v1235_v3  ;;  %1239 = vmatpush.bf16.msra.mxu2 %v1235_v3  ;;  %v1222_v14 = vld [vmem:[%s2091_s4 + $0x8] sm:$0xff]  ;;  %v1221_v16 = vld [vmem:[%s2091_s4] sm:$0xff]  ;;  %v1220_v20 = vld [vmem:[%s2081_s21 + $0x18] sm:$0xff] }
  0x83   : > { %643 = vmatpush.bf16.msra.mxu1 %v1227_v4  ;;  %1247 = vmatpush.bf16.msra.mxu3 %v1227_v4  ;;  %v1217_v17 = vld [vmem:[%s2081_s21] sm:$0xff]  ;;  %v1218_v19 = vld [vmem:[%s2081_s21 + $0x8] sm:$0xff]  ;;  %v453_v22 = vld [vmem:[#allocation2 + $0x30] sm:$0xff]  ;;  %p1207_p9 = scmp.ne.s32.totalorder %s2349_s16, 1 }
  0x84   : > { %v457_v27 = vld [vmem:[#allocation2 + $0x8] sm:$0xff]  ;;  %v454_v31 = vld [vmem:[#allocation2] sm:$0xff]  ;;  %v455_v41 = vld [vmem:[#allocation2 + $0x18] sm:$0xff]  ;;  %s2350_s3 = sld [smem:[#allocation25_spill]] (!%p1207_p9) }
  0x85   : > { %v458_v37 = vld [vmem:[#allocation2 + $0x20] sm:$0xff]  ;;  %v459_v47 = vld [vmem:[#allocation2 + $0x28] sm:$0xff]  ;;  %v456_v51 = vld [vmem:[#allocation2 + $0x10] sm:$0xff]  ;;  %s2351_s21 = sld [smem:[#allocation38_spill]] (!%p1207_p9) }
  0x86   : > { %567 = vmatpush.bf16.msra.mxu0 %v1234_v5  ;;  %1240 = vmatpush.bf16.msra.mxu2 %v1234_v5  ;;  %v460_v57 = vld [vmem:[#allocation2 + $0x38] sm:$0xff] }
  0x87   : > { %644 = vmatpush.bf16.msra.mxu1 %v1226_v6  ;;  %1248 = vmatpush.bf16.msra.mxu3 %v1226_v6 }
  0x8a   : > { %568 = vmatpush.bf16.msra.mxu0 %v1233_v7  ;;  %1241 = vmatpush.bf16.msra.mxu2 %v1233_v7  ;;  %s1208_s25 = sshll.u32 (!%p1207_p9), %s2350_s3, 6 }
  0x8b   : > { %645 = vmatpush.bf16.msra.mxu1 %v1225_v8  ;;  %1249 = vmatpush.bf16.msra.mxu3 %v1225_v8 }
  0x8e   : > { %569 = vmatpush.bf16.msra.mxu0 %v1232_v9  ;;  %1242 = vmatpush.bf16.msra.mxu2 %v1232_v9 }
  0x8f   : > { %646 = vmatpush.bf16.msra.mxu1 %v1224_v10  ;;  %1250 = vmatpush.bf16.msra.mxu3 %v1224_v10 }
  0x92   : > { %570 = vmatpush.bf16.msra.mxu0 %v1231_v11  ;;  %1243 = vmatpush.bf16.msra.mxu2 %v1231_v11 }
  0x93   : > { %647 = vmatpush.bf16.msra.mxu1 %v1223_v12  ;;  %1251 = vmatpush.bf16.msra.mxu3 %v1223_v12 }
  0x96   : > { %571 = vmatpush.bf16.msra.mxu0 %v1230_v13  ;;  %1244 = vmatpush.bf16.msra.mxu2 %v1230_v13 }
  0x97   : > { %648 = vmatpush.bf16.msra.mxu1 %v1222_v14  ;;  %1252 = vmatpush.bf16.msra.mxu3 %v1222_v14 }
  0x9a   : > { %572 = vmatpush.bf16.msra.mxu0 %v1229_v15  ;;  %1245 = vmatpush.bf16.msra.mxu2 %v1229_v15 }
  0x9b   : > { %649 = vmatpush.bf16.msra.mxu1 %v1221_v16  ;;  %1253 = vmatpush.bf16.msra.mxu3 %v1221_v16 }
  0x9d   : > { %573 = vmatmul.bf16.vlgmr.msra.gmra.mxu0 %v1217_v17  ;;  %583 = vmatmul.bf16.vlgmr.msra.gmra.mxu2 %v1219_v18 }
  0x9e   : > { %650 = vmatmul.bf16.vlgmr.msra.gmra.mxu1 %v1217_v17  ;;  %660 = vmatmul.bf16.vlgmr.msra.gmra.mxu3 %v1219_v18 }
  0xad   : > { %578 = vmatmul.bf16.gmra.mxu0 %v1218_v19  ;;  %588 = vmatmul.bf16.gmra.mxu2 %v1220_v20 }
  0xae   : > { %655 = vmatmul.bf16.gmra.mxu1 %v1218_v19  ;;  %665 = vmatmul.bf16.gmra.mxu3 %v1220_v20 }
 0x11a   : > { %v574_v21 = vpop.f32.mrf.mxu0 }
 0x11b   : > { %v651_v23 = vpop.f32.mrf.mxu1 }
 0x11c   : > { %v652_v24 = vadd.f32 %v651_v23, %v574_v21 }
 0x11e   : > { %v671_v25 = vadd.f32 %v652_v24, %v453_v22 }
 0x120   : > { %679 = vst [vmem:[#allocation2 + $0x30] sm:$0xff] %v671_v25  ;;  %v584_v26 = vpop.f32.mrf.mxu2 }
 0x121   : > { %v661_v28 = vpop.f32.mrf.mxu3 }
 0x122   : > { %v662_v29 = vadd.f32 %v661_v28, %v584_v26  ;;  %v576_v30 = vpop.f32.mrf.mxu0 }
 0x123   : > { %v653_v32 = vpop.f32.mrf.mxu1 }
 0x124   : > { %v675_v33 = vadd.f32 %v662_v29, %v457_v27  ;;  %v654_v34 = vadd.f32 %v653_v32, %v576_v30 }
 0x126   : > { %683 = vst [vmem:[#allocation2 + $0x8] sm:$0xff] %v675_v33  ;;  %v672_v35 = vadd.f32 %v654_v34, %v454_v31 }
 0x128   : > { %680 = vst [vmem:[#allocation2] sm:$0xff] %v672_v35  ;;  %v586_v36 = vpop.f32.mrf.mxu2 }
 0x129   : > { %v663_v38 = vpop.f32.mrf.mxu3 }
 0x12a   : > { %v664_v39 = vadd.f32 %v663_v38, %v586_v36  ;;  %v579_v40 = vpop.f32.mrf.mxu0 }
 0x12b   : > { %v656_v42 = vpop.f32.mrf.mxu1 }
 0x12c   : > { %v676_v43 = vadd.f32 %v664_v39, %v458_v37  ;;  %v657_v44 = vadd.f32 %v656_v42, %v579_v40 }
 0x12e   : > { %684 = vst [vmem:[#allocation2 + $0x20] sm:$0xff] %v676_v43  ;;  %v673_v45 = vadd.f32 %v657_v44, %v455_v41 }
 0x130   : > { %681 = vst [vmem:[#allocation2 + $0x18] sm:$0xff] %v673_v45  ;;  %v589_v46 = vpop.f32.mrf.mxu2 }
 0x131   : > { %v666_v48 = vpop.f32.mrf.mxu3 }
 0x132   : > { %v667_v49 = vadd.f32 %v666_v48, %v589_v46  ;;  %v581_v50 = vpop.f32.mrf.mxu0 }
 0x133   : > { %v658_v52 = vpop.f32.mrf.mxu1 }
 0x134   : > { %v677_v53 = vadd.f32 %v667_v49, %v459_v47  ;;  %v659_v54 = vadd.f32 %v658_v52, %v581_v50 }
 0x136   : > { %685 = vst [vmem:[#allocation2 + $0x28] sm:$0xff] %v677_v53  ;;  %v674_v55 = vadd.f32 %v659_v54, %v456_v51 }
 0x138   : > { %682 = vst [vmem:[#allocation2 + $0x10] sm:$0xff] %v674_v55  ;;  %v591_v56 = vpop.f32.mrf.mxu2 }
 0x139   : > { %v668_v58 = vpop.f32.mrf.mxu3 }
 0x13a   : > { %v669_v59 = vadd.f32 %v668_v58, %v591_v56  ;;  %690 = sbr.rel (%p1207_p9) target bundleno = 519 (0x207), region = 64 }
 0x13c   : > { %v678_v60 = vadd.f32 %v669_v59, %v460_v57 }
 0x13e   : > { %686 = vst [vmem:[#allocation2 + $0x38] sm:$0xff] %v678_v60 }
 0x13f   : > { %v714_v61 = vld [vmem:[#allocation9 + $0x78] sm:$0xff]  ;;  %v713_v62 = vld [vmem:[#allocation9 + $0x70] sm:$0xff]  ;;  %v712_v63 = vld [vmem:[#allocation9 + $0x68] sm:$0xff]  ;;  %v769_v21 = vlaneseq  ;;  %v778_v23 = vstv %s1208_s25 }
 0x140   : > { %719 = vmatpush.msra.mxu0 %v714_v61  ;;  %1255 = vmatpush.msra.mxu2 %v714_v61  ;;  %v711_v0 = vld [vmem:[#allocation9 + $0x60] sm:$0xff]  ;;  %v710_v1 = vld [vmem:[#allocation9 + $0x58] sm:$0xff]  ;;  %v709_v2 = vld [vmem:[#allocation9 + $0x50] sm:$0xff] }
 0x141   : > { %1254 = vmatpush.msra.mxu1 %v714_v61  ;;  %1256 = vmatpush.msra.mxu3 %v714_v61  ;;  %v708_v3 = vld [vmem:[#allocation9 + $0x48] sm:$0xff]  ;;  %v707_v4 = vld [vmem:[#allocation9 + $0x40] sm:$0xff]  ;;  %v706_v5 = vld [vmem:[#allocation9 + $0x38] sm:$0xff]  ;;  %v770_v22 = vshrl.u32 %v769_v21, 7 }
 0x142   : > { %720 = vmatpush.msra.mxu0 %v713_v62  ;;  %1258 = vmatpush.msra.mxu2 %v713_v62  ;;  %v705_v6 = vld [vmem:[#allocation9 + $0x30] sm:$0xff]  ;;  %v704_v7 = vld [vmem:[#allocation9 + $0x28] sm:$0xff]  ;;  %v703_v8 = vld [vmem:[#allocation9 + $0x20] sm:$0xff] }
 0x143   : > { %1257 = vmatpush.msra.mxu1 %v713_v62  ;;  %1259 = vmatpush.msra.mxu3 %v713_v62  ;;  %v702_v9 = vld [vmem:[#allocation9 + $0x18] sm:$0xff]  ;;  %v701_v10 = vld [vmem:[#allocation9 + $0x10] sm:$0xff]  ;;  %v700_v11 = vld [vmem:[#allocation9 + $0x8] sm:$0xff]  ;;  %v772_v24 = vadd.s32 16, %v770_v22  ;;  %v779_v26 = vadd.s32 %v778_v23, %v770_v22  ;;  %v774_v29 = vadd.s32 32, %v770_v22  ;;  %v771_v32 = vadd.s32 8, %v770_v22 }
 0x144   : > { %721 = vmatpush.msra.mxu0 %v712_v63  ;;  %1261 = vmatpush.msra.mxu2 %v712_v63  ;;  %v699_v12 = vld [vmem:[#allocation9] sm:$0xff]  ;;  %v691_v13 = vld [vmem:[#allocation2 + $0x30] sm:$0xff]  ;;  %v695_v14 = vld [vmem:[#allocation2 + $0x8] sm:$0xff]  ;;  %v776_v33 = vadd.s32 48, %v770_v22  ;;  %v773_v37 = vadd.s32 24, %v770_v22  ;;  %v775_v43 = vadd.s32 40, %v770_v22 }
 0x145   : > { %1260 = vmatpush.msra.mxu1 %v712_v63  ;;  %1262 = vmatpush.msra.mxu3 %v712_v63  ;;  %v693_v15 = vld [vmem:[#allocation2 + $0x18] sm:$0xff]  ;;  %v697_v16 = vld [vmem:[#allocation2 + $0x28] sm:$0xff]  ;;  %v692_v17 = vld [vmem:[#allocation2] sm:$0xff]  ;;  %v781_v28 = vadd.s32 %v778_v23, %v772_v24  ;;  %vm787_vm0 = vcmp.lt.s32.totalorder %v779_v26, 200  ;;  %v783_v36 = vadd.s32 %v778_v23, %v774_v29  ;;  %v780_v40 = vadd.s32 %v778_v23, %v771_v32 }
 0x146   : > { %722 = vmatpush.msra.mxu0 %v711_v0  ;;  %1264 = vmatpush.msra.mxu2 %v711_v0  ;;  %v696_v18 = vld [vmem:[#allocation2 + $0x20] sm:$0xff]  ;;  %v694_v19 = vld [vmem:[#allocation2 + $0x10] sm:$0xff]  ;;  %v698_v20 = vld [vmem:[#allocation2 + $0x38] sm:$0xff]  ;;  %v785_v42 = vadd.s32 %v778_v23, %v776_v33  ;;  %v782_v47 = vadd.s32 %v778_v23, %v773_v37  ;;  %v784_v53 = vadd.s32 %v778_v23, %v775_v43  ;;  %v777_v54 = vadd.s32 56, %v770_v22 }
 0x147   : > { %1263 = vmatpush.msra.mxu1 %v711_v0  ;;  %1265 = vmatpush.msra.mxu3 %v711_v0  ;;  %v2137_v25 = vld [vmem:[%s2351_s21] ss:$0 sm:$0xff]  ;;  %vm789_vm1 = vcmp.lt.s32.totalorder %v781_v28, 200  ;;  %vm791_vm2 = vcmp.lt.s32.totalorder %v783_v36, 200  ;;  %vm788_vm3 = vcmp.lt.s32.totalorder %v780_v40, 200 }
 0x148   : > { %723 = vmatpush.msra.mxu0 %v710_v1  ;;  %1267 = vmatpush.msra.mxu2 %v710_v1  ;;  %vm793_vm4 = vcmp.lt.s32.totalorder %v785_v42, 200  ;;  %vm790_vm5 = vcmp.lt.s32.totalorder %v782_v47, 200  ;;  %vm792_vm6 = vcmp.lt.s32.totalorder %v784_v53, 200 }
 0x149   : > { %1266 = vmatpush.msra.mxu1 %v710_v1  ;;  %1268 = vmatpush.msra.mxu3 %v710_v1 }
 0x14a   : > { %724 = vmatpush.msra.mxu0 %v709_v2  ;;  %1270 = vmatpush.msra.mxu2 %v709_v2 }
 0x14b   : > { %1269 = vmatpush.msra.mxu1 %v709_v2  ;;  %1271 = vmatpush.msra.mxu3 %v709_v2  ;;  %v786_v2 = vadd.s32 %v778_v23, %v777_v54 }
 0x14c   : > { %725 = vmatpush.msra.mxu0 %v708_v3  ;;  %1273 = vmatpush.msra.mxu2 %v708_v3 }
 0x14d   : > { %1272 = vmatpush.msra.mxu1 %v708_v3  ;;  %1274 = vmatpush.msra.mxu3 %v708_v3  ;;  %vm794_vm7 = vcmp.lt.s32.totalorder %v786_v2, 200 }
 0x14e   : > { %726 = vmatpush.msra.mxu0 %v707_v4  ;;  %1276 = vmatpush.msra.mxu2 %v707_v4 }
 0x14f   : > { %1275 = vmatpush.msra.mxu1 %v707_v4  ;;  %1277 = vmatpush.msra.mxu3 %v707_v4 }
 0x150   : > { %727 = vmatpush.msra.mxu0 %v706_v5  ;;  %1279 = vmatpush.msra.mxu2 %v706_v5 }
 0x151   : > { %1278 = vmatpush.msra.mxu1 %v706_v5  ;;  %1280 = vmatpush.msra.mxu3 %v706_v5 }
 0x152   : > { %728 = vmatpush.msra.mxu0 %v705_v6  ;;  %1282 = vmatpush.msra.mxu2 %v705_v6 }
 0x153   : > { %1281 = vmatpush.msra.mxu1 %v705_v6  ;;  %1283 = vmatpush.msra.mxu3 %v705_v6 }
 0x154   : > { %729 = vmatpush.msra.mxu0 %v704_v7  ;;  %1285 = vmatpush.msra.mxu2 %v704_v7 }
 0x155   : > { %1284 = vmatpush.msra.mxu1 %v704_v7  ;;  %1286 = vmatpush.msra.mxu3 %v704_v7 }
 0x156   : > { %730 = vmatpush.msra.mxu0 %v703_v8  ;;  %1288 = vmatpush.msra.mxu2 %v703_v8 }
 0x157   : > { %1287 = vmatpush.msra.mxu1 %v703_v8  ;;  %1289 = vmatpush.msra.mxu3 %v703_v8 }
 0x158   : > { %731 = vmatpush.msra.mxu0 %v702_v9  ;;  %1291 = vmatpush.msra.mxu2 %v702_v9 }
 0x159   : > { %1290 = vmatpush.msra.mxu1 %v702_v9  ;;  %1292 = vmatpush.msra.mxu3 %v702_v9 }
 0x15a   : > { %732 = vmatpush.msra.mxu0 %v701_v10  ;;  %1294 = vmatpush.msra.mxu2 %v701_v10 }
 0x15b   : > { %1293 = vmatpush.msra.mxu1 %v701_v10  ;;  %1295 = vmatpush.msra.mxu3 %v701_v10 }
 0x15c   : > { %733 = vmatpush.msra.mxu0 %v700_v11  ;;  %1297 = vmatpush.msra.mxu2 %v700_v11 }
 0x15d   : > { %1296 = vmatpush.msra.mxu1 %v700_v11  ;;  %1298 = vmatpush.msra.mxu3 %v700_v11 }
 0x15e   : > { %734 = vmatpush.msra.mxu0 %v699_v12  ;;  %1300 = vmatpush.msra.mxu2 %v699_v12 }
 0x15f   : > { %735 = vmatmul.f32.vlgmr.msra.gmra.mxu0 %v691_v13  ;;  %747 = vmatmul.f32.vlgmr.msra.gmra.mxu2 %v695_v14 }
 0x160   : > { %1299 = vmatpush.msra.mxu1 %v699_v12  ;;  %1301 = vmatpush.msra.mxu3 %v699_v12 }
 0x161   : > { %741 = vmatmul.f32.vlgmr.msra.gmra.mxu1 %v693_v15  ;;  %753 = vmatmul.f32.vlgmr.msra.gmra.mxu3 %v697_v16 }
 0x167   : > { %738 = vmatmul.f32.gmra.mxu0 %v692_v17  ;;  %750 = vmatmul.f32.gmra.mxu2 %v696_v18 }
 0x169   : > { %744 = vmatmul.f32.gmra.mxu1 %v694_v19  ;;  %756 = vmatmul.f32.gmra.mxu3 %v698_v20 }
 0x1dc   : > { %v736_v27 = vpop.f32.mrf.mxu0 }
 0x1dd   : > { %v737_v30 = vadd.f32 %v2137_v25, %v736_v27 }
 0x1de   : > { %v742_v31 = vpop.f32.mrf.mxu1 }
 0x1df   : > { %v760_v34 = vmax.f32 %v737_v30, 0.0  ;;  %v743_v35 = vadd.f32 %v2137_v25, %v742_v31 }
 0x1e1   : > { %v811_v38 = vsel %vm787_vm0, %v760_v34, 0.0  ;;  %v762_v39 = vmax.f32 %v743_v35, 0.0 }
 0x1e2   : > { %819 = vst [vmem:[%s2107_s6] sm:$0xff] %v811_v38  ;;  %v748_v41 = vpop.f32.mrf.mxu2  ;;  %v841_v62 = vmul.f32 %v811_v38, %v811_v38 }
 0x1e3   : > { %v813_v44 = vsel %vm789_vm1, %v762_v39, 0.0  ;;  %v749_v45 = vadd.f32 %v2137_v25, %v748_v41 }
 0x1e4   : > { %821 = vst [vmem:[%s2107_s6 + $0x10] sm:$0xff] %v813_v44  ;;  %v739_v46 = vpop.f32.mrf.mxu0  ;;  %v754_v48 = vpop.f32.mrf.mxu3  ;;  %v843_v5 = vmul.f32 %v813_v44, %v813_v44 }
 0x1e5   : > { %v740_v49 = vadd.f32 %v2137_v25, %v739_v46  ;;  %v764_v50 = vmax.f32 %v749_v45, 0.0  ;;  %v755_v51 = vadd.f32 %v2137_v25, %v754_v48 }
 0x1e6   : > { %v745_v52 = vpop.f32.mrf.mxu1 }
 0x1e7   : > { %v761_v55 = vmax.f32 %v740_v49, 0.0  ;;  %v815_v56 = vsel %vm791_vm2, %v764_v50, 0.0  ;;  %v746_v57 = vadd.f32 %v2137_v25, %v745_v52  ;;  %v766_v58 = vmax.f32 %v755_v51, 0.0 }
 0x1e8   : > { %823 = vst [vmem:[%s2107_s6 + $0x20] sm:$0xff] %v815_v56  ;;  %v845_v16 = vmul.f32 %v815_v56, %v815_v56 }
 0x1e9   : > { %v812_v59 = vsel %vm788_vm3, %v761_v55, 0.0  ;;  %v763_v60 = vmax.f32 %v746_v57, 0.0  ;;  %v817_v61 = vsel %vm793_vm4, %v766_v58, 0.0 }
 0x1ea   : > { %820 = vst [vmem:[%s2107_s6 + $0x8] sm:$0xff] %v812_v59  ;;  %v827_v63 = vadd.f32 %v812_v59, %v811_v38  ;;  %v842_v0 = vmul.f32 %v812_v59, %v812_v59  ;;  %v751_v1 = vpop.f32.mrf.mxu2  ;;  %v847_v23 = vmul.f32 %v817_v61, %v817_v61 }
 0x1eb   : > { %v814_v3 = vsel %vm790_vm5, %v763_v60, 0.0  ;;  %825 = vst [vmem:[%s2107_s6 + $0x30] sm:$0xff] %v817_v61  ;;  %v752_v4 = vadd.f32 %v2137_v25, %v751_v1 }
 0x1ec   : > { %v849_v6 = vadd.f32 %v842_v0, %v841_v62  ;;  %822 = vst [vmem:[%s2107_s6 + $0x18] sm:$0xff] %v814_v3  ;;  %v828_v7 = vadd.f32 %v827_v63, %v813_v44  ;;  %v844_v8 = vmul.f32 %v814_v3, %v814_v3  ;;  %v757_v9 = vpop.f32.mrf.mxu3 }
 0x1ed   : > { %v765_v10 = vmax.f32 %v752_v4, 0.0  ;;  %v758_v11 = vadd.f32 %v2137_v25, %v757_v9 }
 0x1ee   : > { %v829_v12 = vadd.f32 %v828_v7, %v814_v3  ;;  %v850_v13 = vadd.f32 %v849_v6, %v843_v5 }
 0x1ef   : > { %v816_v14 = vsel %vm792_vm6, %v765_v10, 0.0  ;;  %v767_v15 = vmax.f32 %v758_v11, 0.0 }
 0x1f0   : > { %v851_v17 = vadd.f32 %v850_v13, %v844_v8  ;;  %824 = vst [vmem:[%s2107_s6 + $0x28] sm:$0xff] %v816_v14  ;;  %v830_v18 = vadd.f32 %v829_v12, %v815_v56  ;;  %v846_v19 = vmul.f32 %v816_v14, %v816_v14 }
 0x1f1   : > { %v818_v20 = vsel %vm794_vm7, %v767_v15, 0.0 }
 0x1f2   : > { %v831_v21 = vadd.f32 %v830_v18, %v816_v14  ;;  %v852_v22 = vadd.f32 %v851_v17, %v845_v16  ;;  %826 = vst [vmem:[%s2107_s6 + $0x38] sm:$0xff] %v818_v20  ;;  %v848_v27 = vmul.f32 %v818_v20, %v818_v20 }
 0x1f4   : > { %v853_v24 = vadd.f32 %v852_v22, %v846_v19  ;;  %v832_v26 = vadd.f32 %v831_v21, %v817_v61 }
 0x1f6   : > { %v833_v25 = vadd.f32 %v832_v26, %v818_v20  ;;  %v854_v28 = vadd.f32 %v853_v24, %v847_v23 }
 0x1f8   : > { %v834_v29 = vrot.slane %v833_v25, 4  ;;  %v855_v30 = vadd.f32 %v854_v28, %v848_v27 }
 0x1fa   : > { %v835_v31 = vadd.f32 %v834_v29, %v833_v25  ;;  %v856_v32 = vrot.slane %v855_v30, 4 }
 0x1fc   : > { %v836_v33 = vrot.slane %v835_v31, 2  ;;  %v857_v34 = vadd.f32 %v856_v32, %v855_v30 }
 0x1fe   : > { %v837_v35 = vadd.f32 %v836_v33, %v835_v31  ;;  %v858_v36 = vrot.slane %v857_v34, 2 }
 0x200   : > { %v838_v37 = vrot.slane %v837_v35, 1  ;;  %v859_v38 = vadd.f32 %v858_v36, %v857_v34 }
 0x202   : > { %v839_v39 = vadd.f32 %v838_v37, %v837_v35  ;;  %v860_v40 = vrot.slane %v859_v38, 1 }
 0x204   : > { %840 = vst [vmem:[%s422_s18] sm:$0x1] %v839_v39  ;;  %v861_v41 = vadd.f32 %v860_v40, %v859_v38 }
 0x206   : > { %862 = vst [vmem:[%s2302_s7] sm:$0x1] %v861_v41 }
 0x207 PF: > { %s2352_s2 = sld [smem:[#allocation25_spill]]  ;;  %s900_s10 = sshll.u32 %s422_s18, 4  ;;  %s901_s10 = int_to_ptr.vmem [resolvable:$true] %s900_s10 }
 0x208   : > { %s2353_s15 = sld [smem:[#allocation40_spill]]  ;;  %s2167_s19 = scalar_lea.sflag [#allocation13], %s360_s1 }
 0x20e   : > { %s898_s4 = scalar_lea.hbm %s2353_s15, %s2352_s2  ;;  %s1607_s28 = scalar_lea.hbm %s2353_s15, 4 }
 0x20f   : > { %s902_s23 = sshll.u32 %s898_s4, 4  ;;  %s903_s23 = int_to_ptr.hbm [resolvable:$true] %s902_s23 }
 0x210   : > { %s1601_s5 = sshra.s32 %s903_s23, 4  ;;  %s1602_s5 = int_to_ptr.hbm [resolvable:$true] %s1601_s5 }
 0x211   : > { %s1603_s16 = scalar_lea.hbm %s1602_s5, 1  ;;  %p1608_p4 = scmp.lt.s32.totalorder %s1602_s5, %s2353_s15 }
 0x212   : > { %p1604_p12 = scmp.ne.s32.totalorder %s1602_s5, %s1603_s16  ;;  %p1609_p5 = scmp.lt.s32.totalorder %s1607_s28, %s1603_s16 }
 0x214   : > { %p1605_p13 = pnand %p1604_p12, %p2005_p2  ;;  %p1610_p8 = por %p1609_p5, %p1608_p4 }
 0x216   : > { %p1606_p3 = pneg %p1605_p13 }
 0x218   : > { %p1611_p0 = pnand %p1610_p8, %p1606_p3 }
 0x21a   : > { %1614 = shalt.err (!%p1611_p0)
}
 0x21b   : > { %1313 = dma.vmem_to_hbm [thread:$0]  (%p2005_p2), %s901_s10, 16, %s903_s23, %s2167_s19  }
 0x21c   : > { %s1237_s1 = sshll.u32 %s2352_s2, 6  ;;  %s2356_s17 = sld [smem:[#allocation39_spill]] }
 0x21d   : > { %s884_s4 = sshll.u32 %s2107_s6, 4  ;;  %s2357_s25 = sld [smem:[#allocation41_spill]]  ;;  %s885_s4 = int_to_ptr.vmem [resolvable:$true] %s884_s4 }
 0x21e   : > { %s864_s29 = scalar_lea.sflag [#allocation5], %s2104_s30 }
 0x222   : > { %s883_s11 = scalar_lea.hbm %s2356_s17, %s1237_s1  ;;  %s1635_s1 = scalar_lea.hbm %s2356_s17, 256 }
 0x223   : > { %s886_s5 = sshll.u32 %s883_s11, 4  ;;  %s2358_s21 = smov %s2357_s25  ;;  %s887_s5 = int_to_ptr.hbm [resolvable:$true] %s886_s5 }
 0x224   : > { %s911_s28 = scalar_lea.hbm %s2357_s25, %s2352_s2  ;;  %s1629_s7 = sshra.s32 %s887_s5, 4  ;;  %s1630_s7 = int_to_ptr.hbm [resolvable:$true] %s1629_s7 }
 0x225   : > { %s1631_s0 = scalar_lea.hbm %s1630_s7, 64  ;;  %p1636_p7 = scmp.lt.s32.totalorder %s1630_s7, %s2356_s17 }
 0x226   : > { %p1632_p10 = scmp.ne.s32.totalorder %s1630_s7, %s1631_s0  ;;  %p1637_p9 = scmp.lt.s32.totalorder %s1635_s1, %s1631_s0 }
 0x228   : > { %p1633_p11 = pnand %p1632_p10, %p2005_p2  ;;  %p1638_p12 = por %p1637_p9, %p1636_p7 }
 0x22a   : > { %p1634_p6 = pneg %p1633_p11 }
 0x22c   : > { %p1639_p13 = pnand %p1638_p12, %p1634_p6 }
 0x22e   : > { %1642 = shalt.err (!%p1639_p13)
}
 0x22f   : > { %s1809_s2 = smov 128   ;;  %s1810_s20 = smov 8  }
 0x230   : > { %1312 = dma.vmem_to_hbm [thread:$0]  (%p2005_p2), %s885_s4, 1024, %s887_s5, %s864_s29, %s1809_s2, %s1809_s2, %s1810_s20  }
 0x231   : > { %s2359_s11 = scalar_lea.vmem [#allocation14], %s2104_s30  ;;  %s915_s3 = sshll.u32 %s911_s28, 4  ;;  %s916_s3 = int_to_ptr.hbm [resolvable:$true] %s915_s3 }
 0x232   : > { %s913_s16 = sshll.u32 %s2359_s11, 4  ;;  %s1657_s25 = sshra.s32 %s916_s3, 4  ;;  %s914_s16 = int_to_ptr.vmem [resolvable:$true] %s913_s16  ;;  %s1658_s25 = int_to_ptr.hbm [resolvable:$true] %s1657_s25 }
 0x233   : > { %s1659_s10 = scalar_lea.hbm %s1658_s25, 1  ;;  %s1663_s23 = scalar_lea.hbm %s2358_s21, 4 }
 0x234   : > { %p1660_p3 = scmp.ne.s32.totalorder %s1658_s25, %s1659_s10  ;;  %p1664_p8 = scmp.lt.s32.totalorder %s1658_s25, %s2358_s21 }
 0x235   : > { %p1665_p0 = scmp.lt.s32.totalorder %s1663_s23, %s1659_s10 }
 0x236   : > { %p1661_p4 = pnand %p1660_p3, %p2005_p2 }
 0x237   : > { %p1666_p10 = por %p1665_p0, %p1664_p8 }
 0x238   : > { %p1662_p5 = pneg %p1661_p4 }
 0x23a   : > { %p1667_p11 = pnand %p1666_p10, %p1662_p5 }
 0x23c   : > { %1670 = shalt.err (!%p1667_p11)
}
 0x23d   : > { %1314 = dma.vmem_to_hbm [thread:$0]  (%p2005_p2), %s914_s16, 16, %s916_s3, %s2167_s19  }
 0x23e PF: > { %s2360_s30 = sld [smem:[#allocation20_spill]]  ;;  %p1345_p6 = scmp.ge.s32.totalorder %s1801_s14, 2 }
 0x240   : > { %p1333_p7 = pnand %p1345_p6, %p2015_p1 }
 0x242   : > { %p1334_p9 = pneg %p1333_p7 }
 0x244   : > { %s927_s5 = sand.u32 1, %s2360_s30  }
 0x245   : > { %s928_s28 = scalar_lea.sflag [#allocation5], %s927_s5 }
 0x246   : > { %1740 = dma.done.wait (%p1334_p9), %s928_s28, 1024  }
 0x247   : > { %1742 = vsyncadd (%p1334_p9), %s928_s28, 4294966272  ;;  %s2362_s29 = sadd.s32 4294967294, %s1801_s14  }
 0x248   : > { %s937_s18 = sand.u32 1, %s2362_s29  }
 0x249   : > { %s938_s2 = scalar_lea.sflag [#allocation13], %s937_s18 }
 0x24a   : > { %1744 = dma.done.wait (%p1334_p9), %s938_s2, 32  }
 0x24b   : > { %1746 = vsyncadd (%p1334_p9), %s938_s2, 4294967264  ;;  %s31_s14 = sadd.s32 1, %s1801_s14   ;;  %s2364_s19 = sld [smem:[#allocation21_spill]] }
 0x24c   : > { %p2220_p2 = scmp.ge.s32.totalorder %s31_s14, 10   ;;  %s2365_s20 = sld [smem:[#allocation22_spill]] }
 0x24d   : > { %s2366_s28 = sld [smem:[#allocation23_spill]]  ;;  %s2368_s11 = smov %s2058_s24 }
 0x24e   : > { %s2367_s29 = sld [smem:[#allocation27_spill]]  ;;  %s2372_s25 = smov %s1757_s26 }
 0x24f   : > { %s2369_s16 = sld [smem:[#allocation26_spill]]  ;;  %s2373_s26 = smov %s2055_s27 }
 0x250   : > { %s2370_s3 = sld [smem:[#allocation33_spill]]  ;;  %s2375_s30 = smov %s1777_s8 }
 0x251   : > { %s2371_s24 = smov %s2364_s19  ;;  %s2376_s8 = smov %s1781_s9 }
 0x252   : > { %s2374_s27 = smov %s2365_s20  ;;  %s2377_s9 = smov %s2368_s11 }
 0x253   : > { %s2378_s10 = smov %s1793_s12  ;;  %s2379_s11 = smov %s1797_s13 }
 0x254   :  { %30 = sbr.rel (!%p2220_p2) target bundleno = 24 (0x18), region = 153 }
 0x255   : > { %s2380_s12 = smov %s2369_s16 }
 0x256   : > { %s2381_s13 = smov %s2370_s3 }
 0x259   :  { %952 = vsyncpa [#allocation4], 1 }
 0x25a   :  { %954 = vsyncpa [#allocation4 + $0x1], 1 }
 0x25b   :  { %955 = vsyncpa [#allocation7], 1 }
 0x25c   :  { %957 = vsyncpa [#allocation7 + $0x1], 1 }
 0x25d   :  { %958 = vsyncpa [#allocation10], 1 }
 0x25e   :  { %959 = vsyncpa [#allocation5], 1 }
 0x25f   :  { %961 = vsyncpa [#allocation5 + $0x1], 1 }
 0x260   :  { %962 = vsyncpa [#allocation13], 1 }
 0x261   :  { %964 = vsyncpa [#allocation13 + $0x1], 1 }

</bundles_post_ra>
